<compile_context>
chip_gen: v7x
topology: tpu7x:2x2x1
jax: 0.10.0
libtpu: 0.0.40
codegen_flags: <defaults>
</compile_context>

<pallas_src>
import functools

import jax
import jax.numpy as jnp
from jax import lax
from jax.experimental import pallas as pl
from jax.experimental.pallas import tpu as pltpu


def _vmem_capacity_bytes():
    """Trace-time VMEM capacity; conservative fallback works on every chip."""
    try:
        info = pltpu.get_tpu_info()
        cap = getattr(info, "vmem_capacity_bytes", None)
        if cap:
            return int(cap)
    except Exception:
        pass
    return 64 * 2**20  # v7x per-core VMEM; safe lower bound for v5e/v6e too.


def _alpha_loss_kernel(yv_ref, v_ref, yp_ref, p_ref, out_ref, *,
                       tile_rows, tiles_per_core, batch, num_classes):
    """One batch tile of the AlphaZero loss.

    yv_ref, v_ref : (1, B)       lane-dense value target / prediction (fetched once)
    yp_ref, p_ref : (tb, P)      policy distribution tiles
    out_ref       : (8, P) f32   per-core partial-sum block, resident across the
                                 reduction axis (accumulated in place)
    """
    c = pl.program_id(0)   # core-split axis ("parallel")
    j = pl.program_id(1)   # batch-tile reduction axis ("arbitrary")

    @pl.when(j == 0)
    def _():
        out_ref[...] = jnp.zeros_like(out_ref)

    # ---- value term: computed once, on core 0's first step only --------------
    @pl.when((c == 0) & (j == 0))
    def _():
        d = v_ref[...].astype(jnp.float32) - yv_ref[...].astype(jnp.float32)
        vsum = jnp.sum(d * d)
        sel = ((lax.broadcasted_iota(jnp.int32, out_ref.shape, 0) == 0)
               & (lax.broadcasted_iota(jnp.int32, out_ref.shape, 1) == 0))
        out_ref[...] += jnp.where(sel, vsum, jnp.float32(0.0))

    # ---- policy term for this batch tile --------------------------------------
    # Accumulate -policy * log(1e-8 + y_policy); the minus sign is folded into
    # the subtract below.  Rows beyond the true batch (edge tile, or phantom
    # tiles on a short core) are masked to zero.
    start = (c * tiles_per_core + j) * tile_rows
    yp = yp_ref[...].astype(jnp.float32)
    p = p_ref[...].astype(jnp.float32)
    prod = p * jnp.log(jnp.float32(1e-8) + yp)                    # (tb, P)
    row = lax.broadcasted_iota(jnp.int32, (tile_rows, num_classes), 0)
    prod = jnp.where(start + row < batch, prod, jnp.float32(0.0))

    if tile_rows % 8 == 0:
        # Fold sublane groups with VPU-only vreg adds into the resident (8, P)
        # output block; no per-step cross-lane XLU reduction.
        part = jnp.sum(prod.reshape(tile_rows // 8, 8, num_classes), axis=0)
        out_ref[...] -= part
    else:
        # Tiny-batch fallback (tile_rows == batch < 8, full-dim block).
        out_ref[0:1, :] -= jnp.sum(prod, axis=0, keepdims=True)


def alpha_loss(y_value, value, y_policy, policy, *, max_block_rows=None):
    """y_value, value: (B,) or (B,1); y_policy, policy: (B, P). Returns scalar f32."""
    B, P = policy.shape
    assert y_policy.shape == (B, P)

    NUM_CORES = 2  # v7x has 2 TensorCores; harmless (sequential) on v5e/v6e.

    p_item = jnp.dtype(policy.dtype).itemsize
    v_item = jnp.dtype(value.dtype).itemsize

    # ---- generation-aware VMEM budget & batch-tile size ----------------------
    vmem_cap = _vmem_capacity_bytes()
    scoped_cap = max(32 * 2**20, (vmem_cap * 3) // 4)   # ~48 MiB v7x, ~96 MiB v5e/v6e
    per_block_budget = min(8 * 2**20, scoped_cap // 8)  # 2 inputs x 2 buffers <= cap/2

    if B < 8:
        tb = B                                          # full-dim block (tiny batch)
    else:
        tb = per_block_budget // max(1, P * p_item)
        tb = max(8, min((tb // 8) * 8, (B // 8) * 8))
        if max_block_rows is not None:
            tb = max(8, min(tb, (max_block_rows // 8) * 8))
    num_tiles = -(-B // tb)
    tiles_per_core = -(-num_tiles // NUM_CORES)

    # ---- lane-dense value vectors (no batch padding anywhere) -----------------
    yv = jnp.reshape(y_value, (1, B))
    v = jnp.reshape(value, (1, B))

    nblk = num_tiles
    tpc = tiles_per_core

    def policy_map(c, j):
        # Clamp phantom tiles (short tail core) onto the last real block; their
        # rows are masked to zero in the kernel, and the repeated block index
        # lets the pipeline skip the re-fetch.
        return (jnp.minimum(c * tpc + j, nblk - 1), 0)

    # ---- compiler params / cost hint ------------------------------------------
    dbuf_bytes = (2 * 2 * tb * P * p_item      # 2 policy inputs, double-buffered
                  + 2 * 2 * B * v_item         # 2 value vectors
                  + 2 * 8 * P * 4)             # resident output partial blocks
    vmem_limit = int(min(scoped_cap, max(32 * 2**20, 2 * dbuf_bytes)))

    cost = pl.CostEstimate(
        flops=4 * B * P + 3 * B,
        transcendentals=B * P,
        bytes_accessed=2 * B * P * p_item + 2 * B * v_item + NUM_CORES * 8 * P * 4,
    )

    kernel = functools.partial(
        _alpha_loss_kernel,
        tile_rows=tb, tiles_per_core=tiles_per_core, batch=B, num_classes=P)

    partials = pl.pallas_call(
        kernel,
        out_shape=jax.ShapeDtypeStruct((NUM_CORES * 8, P), jnp.float32),
        grid=(NUM_CORES, tiles_per_core),
        in_specs=[
            pl.BlockSpec((1, B), lambda c, j: (0, 0)),   # y_value  (fetched once)
            pl.BlockSpec((1, B), lambda c, j: (0, 0)),   # value    (fetched once)
            pl.BlockSpec((tb, P), policy_map),           # y_policy
            pl.BlockSpec((tb, P), policy_map),           # policy
        ],
        out_specs=pl.BlockSpec((8, P), lambda c, j: (c, 0)),
        compiler_params=pltpu.CompilerParams(
            dimension_semantics=("parallel", "arbitrary"),
            vmem_limit_bytes=vmem_limit,
        ),
        cost_estimate=cost,
    )(yv, v, y_policy, policy)

    # partials sums to  sum((v - yv)^2) + sum_b sum_p(-p * log(1e-8 + yp));
    # the mean over the true batch size finishes the loss (tiny XLA epilogue).
    return jnp.sum(partials) / jnp.float32(B)


def alpha_loss_ref(y_value, value, y_policy, policy):
    value_error = (jnp.reshape(value, (-1,)).astype(jnp.float32)
                   - jnp.reshape(y_value, (-1,)).astype(jnp.float32)) ** 2
    policy_error = jnp.sum(
        -policy.astype(jnp.float32) * jnp.log(1e-8 + y_policy.astype(jnp.float32)),
        axis=1,
    )
    return jnp.mean(value_error + policy_error)


if __name__ == "__main__":
    key = jax.random.PRNGKey(0)
    ks = jax.random.split(key, 12)

    def make(kv0, kv1, kp0, kp1, B, P, pol_dtype):
        y_value = jnp.tanh(jax.random.normal(kv0, (B, 1), dtype=jnp.float32))
        value = jax.random.uniform(kv1, (B, 1), minval=-1.0, maxval=1.0,
                                   dtype=jnp.float32)
        y_policy = jax.nn.softmax(
            jax.random.normal(kp0, (B, P), dtype=jnp.float32), axis=-1
        ).astype(pol_dtype)
        policy = jax.nn.softmax(
            jax.random.normal(kp1, (B, P), dtype=jnp.float32), axis=-1
        ).astype(pol_dtype)
        return y_value, value, y_policy, policy

    # --- test 1: small aligned batch, f32 policies ----------------------------
    a = make(ks[0], ks[1], ks[2], ks[3], 8, 64, jnp.float32)
    out1 = jax.block_until_ready(alpha_loss(*a))
    ref1 = jax.block_until_ready(alpha_loss_ref(*a))
    assert jnp.allclose(out1, ref1, rtol=1e-5, atol=1e-5), (out1, ref1)

    # --- test 2: non-aligned batch (200), bf16 policies, forced multi-tile -----
    #     exercises the in-kernel tail mask, the phantom-tile clamp and the
    #     2-way core split (grid = (2, 2), tiles of 64 rows).
    b = make(ks[4], ks[5], ks[6], ks[7], 200, 128, jnp.bfloat16)
    out2 = jax.block_until_ready(alpha_loss(*b, max_block_rows=64))
    ref2 = jax.block_until_ready(alpha_loss_ref(*b))
    assert jnp.allclose(out2, ref2, rtol=1e-4, atol=1e-4), (out2, ref2)

    # --- test 3: tiny batch (< 8 rows) with odd class count: full-dim block ----
    c = make(ks[8], ks[9], ks[10], ks[11], 5, 33, jnp.float32)
    out3 = jax.block_until_ready(alpha_loss(*c))
    ref3 = jax.block_until_ready(alpha_loss_ref(*c))
    assert jnp.allclose(out3, ref3, rtol=1e-5, atol=1e-5), (out3, ref3)

    # TODO(synk): if AlphaLoss is ever called with a traced/dynamic batch size,
    # hoist the static `batch`/`tile_rows` closure into scalar-prefetch SMEM
    # args to avoid per-batch-size recompiles (shapes are static today anyway).
    print("KERNEL_OK")
</pallas_src>

<mosaic_0001>
module attributes {stable_mosaic.version = 11 : i64} {
  func.func @_alpha_loss_kernel(%arg0: i32, %arg1: i32, %arg2: memref<1x8xf32, #tpu.memory_space<vmem>>, %arg3: memref<1x8xf32, #tpu.memory_space<vmem>>, %arg4: memref<8x64xf32, #tpu.memory_space<vmem>>, %arg5: memref<8x64xf32, #tpu.memory_space<vmem>>, %arg6: memref<8x64xf32, #tpu.memory_space<vmem>>) attributes {dimension_semantics = [#tpu.dimension_semantics<parallel>, #tpu.dimension_semantics<arbitrary>], iteration_bounds = array<i64: 2, 1>, scalar_prefetch = 0 : i64, scratch_operands = 0 : i64, tpu.core_type = #tpu.core_type<tc>, window_params = [{pipeline_mode = #tpu.pipeline_mode<synchronous>, transform_indices = @transform_0, window_bounds = array<i64: 1, 8>}, {pipeline_mode = #tpu.pipeline_mode<synchronous>, transform_indices = @transform_1, window_bounds = array<i64: 1, 8>}, {transform_indices = @transform_2, window_bounds = array<i64: 8, 64>}, {transform_indices = @transform_3, window_bounds = array<i64: 8, 64>}, {transform_indices = @transform_4, window_bounds = array<i64: 8, 64>}]} {
    %c0_i32 = arith.constant 0 : i32
    %0 = arith.cmpi eq, %arg1, %c0_i32 : i32
    %1 = arith.extui %0 : i1 to i32
    %c0_i32_0 = arith.constant 0 : i32
    %2 = arith.cmpi ne, %1, %c0_i32_0 : i32
    scf.if %2 {
      %cst_14 = arith.constant 0.000000e+00 : f32
      %29 = vector.broadcast %cst_14 : f32 to vector<8x64xf32>
      %c0_15 = arith.constant 0 : index
      %c0_16 = arith.constant 0 : index
      %30 = vector.load %arg6[%c0_15, %c0_16] : memref<8x64xf32, #tpu.memory_space<vmem>>, vector<8x64xf32>
      tpu.vector_store %arg6[%c0_15, %c0_16], %29 {strides = array<i32>} : memref<8x64xf32, #tpu.memory_space<vmem>>, vector<8x64xf32>,
    } else {
    }
    %c0_i32_1 = arith.constant 0 : i32
    %3 = arith.cmpi eq, %arg0, %c0_i32_1 : i32
    %c0_i32_2 = arith.constant 0 : i32
    %4 = arith.cmpi eq, %arg1, %c0_i32_2 : i32
    %5 = arith.andi %3, %4 : i1
    %6 = arith.extui %5 : i1 to i32
    %c0_i32_3 = arith.constant 0 : i32
    %7 = arith.cmpi ne, %6, %c0_i32_3 : i32
    scf.if %7 {
      %c0_14 = arith.constant 0 : index
      %c0_15 = arith.constant 0 : index
      %29 = vector.load %arg3[%c0_14, %c0_15] : memref<1x8xf32, #tpu.memory_space<vmem>>, vector<1x8xf32>
      %c0_16 = arith.constant 0 : index
      %c0_17 = arith.constant 0 : index
      %30 = vector.load %arg2[%c0_16, %c0_17] : memref<1x8xf32, #tpu.memory_space<vmem>>, vector<1x8xf32>
      %31 = arith.subf %29, %30 : vector<1x8xf32>
      %32 = arith.mulf %31, %31 : vector<1x8xf32>
      %33 = vector.shape_cast %32 : vector<1x8xf32> to vector<1x1x8xf32>
      %cst_18 = arith.constant dense<0.000000e+00> : vector<1xf32>
      %34 = vector.multi_reduction <add>, %33, %cst_18 [1, 2] : vector<1x1x8xf32> to vector<1xf32>
      %35 = vector.shape_cast %34 : vector<1xf32> to vector<1x1x1xf32>
      %36 = vector.extract %35[0, 0, 0] : f32 from vector<1x1x1xf32>
      %37 = tpu.iota {dimensions = array<i32: 0>} : vector<8x64xi32>
      %c0_i32_19 = arith.constant 0 : i32
      %38 = vector.broadcast %c0_i32_19 : i32 to vector<8x64xi32>
      %39 = arith.cmpi eq, %37, %38 : vector<8x64xi32>
      %40 = tpu.iota {dimensions = array<i32: 1>} : vector<8x64xi32>
      %c0_i32_20 = arith.constant 0 : i32
      %41 = vector.broadcast %c0_i32_20 : i32 to vector<8x64xi32>
      %42 = arith.cmpi eq, %40, %41 : vector<8x64xi32>
      %43 = arith.andi %39, %42 : vector<8x64xi1>
      %c0_21 = arith.constant 0 : index
      %c0_22 = arith.constant 0 : index
      %44 = vector.load %arg6[%c0_21, %c0_22] : memref<8x64xf32, #tpu.memory_space<vmem>>, vector<8x64xf32>
      %cst_23 = arith.constant 0.000000e+00 : f32
      %45 = vector.broadcast %36 : f32 to vector<8x64xf32>
      %46 = vector.broadcast %cst_23 : f32 to vector<8x64xf32>
      %47 = arith.select %43, %45, %46 : vector<8x64xi1>, vector<8x64xf32>
      %48 = arith.addf %44, %47 : vector<8x64xf32>
      %c0_24 = arith.constant 0 : index
      %c0_25 = arith.constant 0 : index
      %49 = vector.load %arg6[%c0_24, %c0_25] : memref<8x64xf32, #tpu.memory_space<vmem>>, vector<8x64xf32>
      tpu.vector_store %arg6[%c0_24, %c0_25], %48 {strides = array<i32>} : memref<8x64xf32, #tpu.memory_space<vmem>>, vector<8x64xf32>,
    } else {
    }
    %c1_i32 = arith.constant 1 : i32
    %8 = arith.muli %arg0, %c1_i32 : i32
    %9 = arith.addi %8, %arg1 : i32
    %c8_i32 = arith.constant 8 : i32
    %10 = arith.muli %9, %c8_i32 : i32
    %c0 = arith.constant 0 : index
    %c0_4 = arith.constant 0 : index
    %11 = vector.load %arg4[%c0, %c0_4] : memref<8x64xf32, #tpu.memory_space<vmem>>, vector<8x64xf32>
    %c0_5 = arith.constant 0 : index
    %c0_6 = arith.constant 0 : index
    %12 = vector.load %arg5[%c0_5, %c0_6] : memref<8x64xf32, #tpu.memory_space<vmem>>, vector<8x64xf32>
    %cst = arith.constant 9.99999993E-9 : f32
    %13 = vector.broadcast %cst : f32 to vector<8x64xf32>
    %14 = arith.addf %13, %11 : vector<8x64xf32>
    %15 = math.log %14 : vector<8x64xf32>
    %16 = arith.mulf %12, %15 : vector<8x64xf32>
    %17 = tpu.iota {dimensions = array<i32: 0>} : vector<8x64xi32>
    %18 = vector.broadcast %10 : i32 to vector<8x64xi32>
    %19 = arith.addi %18, %17 : vector<8x64xi32>
    %c8_i32_7 = arith.constant 8 : i32
    %20 = vector.broadcast %c8_i32_7 : i32 to vector<8x64xi32>
    %21 = arith.cmpi slt, %19, %20 : vector<8x64xi32>
    %cst_8 = arith.constant 0.000000e+00 : f32
    %22 = vector.broadcast %cst_8 : f32 to vector<8x64xf32>
    %23 = arith.select %21, %16, %22 : vector<8x64xi1>, vector<8x64xf32>
    %24 = vector.shape_cast %23 : vector<8x64xf32> to vector<1x8x64xf32>
    %cst_9 = arith.constant dense<0.000000e+00> : vector<8x64xf32>
    %25 = vector.multi_reduction <add>, %24, %cst_9 [0] : vector<1x8x64xf32> to vector<8x64xf32>
    %c0_10 = arith.constant 0 : index
    %c0_11 = arith.constant 0 : index
    %26 = vector.load %arg6[%c0_10, %c0_11] : memref<8x64xf32, #tpu.memory_space<vmem>>, vector<8x64xf32>
    %27 = arith.subf %26, %25 : vector<8x64xf32>
    %c0_12 = arith.constant 0 : index
    %c0_13 = arith.constant 0 : index
    %28 = vector.load %arg6[%c0_12, %c0_13] : memref<8x64xf32, #tpu.memory_space<vmem>>, vector<8x64xf32>
    tpu.vector_store %arg6[%c0_12, %c0_13], %27 {strides = array<i32>} : memref<8x64xf32, #tpu.memory_space<vmem>>, vector<8x64xf32>,
    return
  }
  func.func @transform_0(%arg0: i32, %arg1: i32) -> (i32, i32) {
    %c0_i32 = arith.constant 0 : i32
    %c0_i32_0 = arith.constant 0 : i32
    %c0_i32_1 = arith.constant 0 : i32
    return %c0_i32, %c0_i32_0 : i32, i32
  }
  func.func @transform_1(%arg0: i32, %arg1: i32) -> (i32, i32) {
    %c0_i32 = arith.constant 0 : i32
    %c0_i32_0 = arith.constant 0 : i32
    %c0_i32_1 = arith.constant 0 : i32
    return %c0_i32, %c0_i32_0 : i32, i32
  }
  func.func @transform_2(%arg0: i32, %arg1: i32) -> (i32, i32) {
    %c1_i32 = arith.constant 1 : i32
    %0 = arith.muli %arg0, %c1_i32 : i32
    %1 = arith.addi %0, %arg1 : i32
    %c0_i32 = arith.constant 0 : i32
    %2 = arith.minsi %1, %c0_i32 : i32
    %c0_i32_0 = arith.constant 0 : i32
    %c0_i32_1 = arith.constant 0 : i32
    return %2, %c0_i32_0 : i32, i32
  }
  func.func @transform_3(%arg0: i32, %arg1: i32) -> (i32, i32) {
    %c1_i32 = arith.constant 1 : i32
    %0 = arith.muli %arg0, %c1_i32 : i32
    %1 = arith.addi %0, %arg1 : i32
    %c0_i32 = arith.constant 0 : i32
    %2 = arith.minsi %1, %c0_i32 : i32
    %c0_i32_0 = arith.constant 0 : i32
    %c0_i32_1 = arith.constant 0 : i32
    return %2, %c0_i32_0 : i32, i32
  }
  func.func @transform_4(%arg0: i32, %arg1: i32) -> (i32, i32) {
    %c0_i32 = arith.constant 0 : i32
    %c0_i32_0 = arith.constant 0 : i32
    return %arg0, %c0_i32 : i32, i32
  }
}

</mosaic_0001>

<bundles_post_ra>
// kernel: tpu_custom_call.1
= control target key start
LH: loop header
LB: loop body
LE: loop exit
PB: predicated region body
PF: predicated region fallthrough
CT: control target
= control target key end

     0   :  { %9 = vsyncpa [#allocation3], 0  ;;  %s1018_s0 = inlined_call_operand.hbm [shape: f32[1,8], index: 0, kind: input, shape index: {}]   ;;  %s1019_s1 = inlined_call_operand.vmem [shape: f32[1,8], index: 1, kind: input, shape index: {}]   ;;  %s1020_s2 = inlined_call_operand.hbm [shape: f32[8,64], index: 2, kind: input, shape index: {}]   ;;  %s1021_s3 = inlined_call_operand.vmem [shape: f32[8,64], index: 3, kind: input, shape index: {}]   ;;  %s1022_s4 = inlined_call_operand.hbm [shape: f32[16,64], index: 4, kind: output, shape index: {}]  }
   0x1   :  { %10 = vsyncpa [#allocation6], 0 }
   0x2   :  { %12 = vsyncpa [#allocation6 + $0x1], 0 }
   0x3   :  { %13 = vsyncpa [#allocation4], 0 }
   0x4   :  { %15 = vsyncpa [#allocation4 + $0x1], 0  ;;  %s782_s15 = smov 0   ;;  %s784_s16 = smov 0  }
   0x5   :  { %s786_s17 = smov 0   ;;  %s788_s18 = smov 0  }
   0x6   :  { %s790_s19 = smov 0   ;;  %s792_s20 = smov 0  }
   0x7   :  { %s794_s21 = smov 0   ;;  %s796_s22 = smov 0  }
   0x8 LB: > { %s462_s23 = sadd.s32 4294967295, %s751_s22   ;;  %s463_s24 = sadd.s32 4294967294, %s751_s22   ;;  %s751_s22 = sphi %s796_s22, %s21_s22   ;;  %s747_s21 = sphi %s794_s21, %s1050_s21   ;;  %s743_s20 = sphi %s792_s20, %s1049_s20   ;;  %s739_s19 = sphi %s790_s19, %s1008_s19   ;;  %s735_s18 = sphi %s788_s18, %s1048_s18   ;;  %s731_s17 = sphi %s786_s17, %s1047_s17   ;;  %s727_s16 = sphi %s784_s16, %s1046_s16   ;;  %s723_s15 = sphi %s782_s15, %s1045_s15  }
   0x9   : > { %p101_p0 = scmp.ne.s32.totalorder %s739_s19, %s735_s18  ;;  %p823_p1 = scmp.eq.s32.totalorder %s462_s23, 0 }
   0xa   : > { %s146_s26 = sadd.s32 1, %s731_s17  ;;  %p156_p2 = scmp.ne.s32.totalorder %s731_s17, %s727_s16 }
   0xb   : > { %s1029_s25 = scalar_select %p823_p1, 1, 0 }
   0xc   : > { %p832_p3 = por %p823_p1, %p101_p0  ;;  %p157_p4 = scmp.eq.s32.totalorder %s462_s23, 1 }
   0xd   : > { %p162_p5 = scmp.ne.s32.totalorder %s727_s16, %s723_s15  ;;  %p163_p6 = scmp.eq.s32.totalorder %s463_s24, 1 }
   0xe   : > { %s1030_s27 = scalar_select %p832_p3, 1, 0 }
   0xf   : > { %p838_p7 = por %p157_p4, %p156_p2  ;;  %p464_p8 = scmp.ge.s32.totalorder %s751_s22, 1 }
  0x10   : > { %p843_p9 = por %p163_p6, %p162_p5  ;;  %p170_p10 = scmp.lt.s32.totalorder %s751_s22, 3 }
  0x11   : > { %s1031_s28 = scalar_select %p838_p7, 1, 0 }
  0x12   : > { %s1032_s29 = scalar_select %p843_p9, 1, 0 }
  0x13   : > { %p848_p11 = pnand %p464_p8, %p170_p10  ;;  %s753_s5 = smov [#allocation2]  }
  0x14   : > { %s183_s6 = sshll.u32 %s753_s5, 4  ;;  %s33_s8 = sadd.s32 1, %s747_s21  ;;  %s184_s6 = int_to_ptr.vmem [resolvable:$true] %s183_s6 }
  0x15   : > { %s1033_s30 = scalar_select %p848_p11, 1, 0 }
  0x16   : > { %p494_p13 = pneg %p848_p11  ;;  %p862_p2 = scmp.ge.s32.totalorder %s33_s8, 2 }
  0x17   : > { %s586_s12 = scalar_lea.hbm %s1018_s0, 16 }
  0x18   : > { %p857_p0 = pnand %p494_p13, %p823_p1  ;;  %p587_p4 = scmp.ne.s32.totalorder %s1018_s0, %s586_s12 }
  0x19   : > { %s1035_s9 = scalar_select %p862_p2, 1, 0 }
  0x1a   : > { %p588_p5 = pneg %p857_p0  ;;  %p593_p10 = scmp.lt.u32.totalorder %s586_s12, %s1018_s0 }
  0x1c   : > { %p589_p6 = pnand %p588_p5, %p587_p4 }
  0x1e   : > { %p590_p8 = pneg %p589_p6 }
  0x20   : > { %p595_p13 = pnand %p593_p10, %p590_p8 }
  0x22   : > { %598 = shalt.err (!%p595_p13)
}
  0x23   : > { %s599_s24 = scalar_lea.vmem %s184_s6, 16  ;;  %s606_s5 = scalar_lea.vmem %s184_s6, 32 }
  0x24   : > { %p600_p12 = scmp.ne.s32.totalorder %s184_s6, %s599_s24  ;;  %p607_p3 = scmp.lt.s32.totalorder %s184_s6, %s184_s6 }
  0x25   : > { %p608_p1 = scmp.lt.s32.totalorder %s606_s5, %s599_s24 }
  0x26   : > { %p602_p9 = pnand %p600_p12, %p588_p5 }
  0x27   : > { %p609_p11 = por %p608_p1, %p607_p3 }
  0x28   : > { %p603_p7 = pneg %p602_p9 }
  0x2a   : > { %p610_p2 = pnand %p609_p11, %p603_p7 }
  0x2c   : > { %613 = shalt.err (!%p610_p2)
}
  0x2d   : > { %497 = dma.hbm_to_vmem [thread:$0]  (!%p857_p0), %s1018_s0, 16, %s184_s6, [#allocation3]  }
  0x2e   : > { %p1036_p9 = scmp.ne.s32.totalorder %s1035_s9, 0  ;;  %p720_p1 = scmp.ne.s32.totalorder %s739_s19, 0 }
  0x2f   : > { %p96_p3 = scmp.eq.s32.totalorder %s751_s22, 0  ;;  %p507_p12 = scmp.lt.s32.totalorder %s751_s22, 2 }
  0x30   : > { %s1052_s8 = smov (%p1036_p9, %s33_s8), 0  ;;  %s754_s13 = smov [#allocation5]  }
  0x31   : > { %p97_p7 = por %p720_p1, %p96_p3  ;;  %s143_s12 = ssub.s32 %s747_s21, %s1052_s8 }
  0x32   : > { %p144_p11 = scmp.eq.s32.totalorder %s143_s12, 0  ;;  %s211_s14 = sshll.u32 %s754_s13, 4  ;;  %s212_s14 = int_to_ptr.vmem [resolvable:$true] %s211_s14 }
  0x33   : > { %p896_p2 = pnand %p507_p12, %p97_p7  ;;  %s614_s23 = scalar_lea.hbm %s1020_s2, 128 }
  0x34   : > { %s894_s7 = scalar_select %p144_p11, %s731_s17, %s146_s26  }
  0x35   : > { %s1037_s18 = scalar_select %p896_p2, 1, 0 }
  0x36   : > { %p615_p0 = scmp.ne.s32.totalorder %s1020_s2, %s614_s23  ;;  %p616_p4 = pneg %p896_p2 }
  0x37   : > { %p621_p8 = scmp.lt.u32.totalorder %s614_s23, %s614_s23  ;;  %p623_p10 = scmp.lt.u32.totalorder %s614_s23, %s1020_s2 }
  0x38   : > { %p617_p5 = pnand %p616_p4, %p615_p0 }
  0x39   : > { %p624_p13 = por %p623_p10, %p621_p8 }
  0x3a   : > { %p618_p6 = pneg %p617_p5 }
  0x3c   : > { %p625_p9 = pnand %p624_p13, %p618_p6 }
  0x3e   : > { %628 = shalt.err (!%p625_p9)
}
  0x3f   : > { %s629_s11 = scalar_lea.vmem %s212_s14, 128  ;;  %s636_s12 = scalar_lea.vmem %s212_s14, 256 }
  0x40   : > { %p630_p1 = scmp.ne.s32.totalorder %s212_s14, %s629_s11  ;;  %p637_p11 = scmp.lt.s32.totalorder %s212_s14, %s212_s14 }
  0x41   : > { %p638_p12 = scmp.lt.s32.totalorder %s636_s12, %s629_s11 }
  0x42   : > { %p632_p3 = pnand %p630_p1, %p616_p4 }
  0x43   : > { %p639_p2 = por %p638_p12, %p637_p11 }
  0x44   : > { %p633_p7 = pneg %p632_p3 }
  0x46   : > { %p640_p0 = pnand %p639_p2, %p633_p7 }
  0x48   : > { %643 = shalt.err (!%p640_p0)
}
  0x49   : > { %p1038_p5 = scmp.ne.s32.totalorder %s1037_s18, 0  ;;  %p1039_p8 = scmp.ne.s32.totalorder %s1033_s30, 0 }
  0x4a   : > { %p1040_p6 = scmp.ne.s32.totalorder (!%p1039_p8), %s1029_s25, 0 }
  0x4b   : > { %501 = dma.hbm_to_vmem [thread:$0]  (!%p1038_p5), %s1020_s2, 128, %s212_s14, [#allocation6]  }
  0x4c   : > { %233 = sbr.rel (%p1039_p8) target bundleno = 341 (0x155), region = 36 }
  0x53   : > { %709 = dma.done.wait (%p1040_p6), [#allocation3], 16  }
  0x54   : > { %711 = vsyncadd (%p1040_p6), [#allocation3], 4294967280  ;;  %s239_s9 = sand.u32 1, %s739_s19   ;;  %p1041_p2 = scmp.ne.s32.totalorder %s1030_s27, 0 }
  0x55   : > { %s923_s23 = sshll.u32 %s239_s9, 3  ;;  %s240_s18 = scalar_lea.sflag [#allocation6], %s239_s9 }
  0x56   : > { %s243_s24 = scalar_lea.vmem [#allocation5], %s923_s23 }
  0x57   : > { %713 = dma.done.wait (%p1041_p2), %s240_s18, 128  }
  0x58   : > { %715 = vsyncadd (%p1041_p2), %s240_s18, 4294967168  ;;  %s272_s25 = sand.u32 1, %s727_s16   ;;  %p279_p4 = scmp.lt.s32.totalorder %s743_s20, 0  ;;  %vm292_vm0 = vcmask 523264   ;;  %v755_v0 = vmov 0.0  }
  0x59   : > { %s472_s30 = sshll.u32 %s272_s25, 3  ;;  %p294_p10 = scmp.eq.s32.totalorder %s743_s20, 0 }
  0x5a   : > { %s280_s14 = scalar_select %p279_p4, %s743_s20, 0 }
  0x5b   : > { %s936_s5 = scalar_lea.vmem [#allocation7], %s472_s30  ;;  %298 = sbr.rel (!%p294_p10) target bundleno = 306 (0x132), region = 52  ;;  %v299_v1 = vld [vmem:[%s1019_s1] sm:$0x1] (%p294_p10)  ;;  %v300_v2 = vld [vmem:[#allocation2] sm:$0x1] (%p294_p10)  ;;  %v314_v13 = vlaneseq (%p294_p10) }
  0x5c   : > { %293 = vst.msk [vmem:[%s936_s5] sm:$0xff] %vm292_vm0, %v755_v0  ;;  %s1054_s14 = smov (!%p279_p4, %s280_s14), 0  ;;  %v301_v3 = vsub.f32 (%p294_p10), %v299_v1, %v300_v2  ;;  %vm303_vm1 = vcmask (%p294_p10), 57344  }
  0x5d   : > { %s476_s27 = sshll.u32 %s1054_s14, 3  ;;  %v315_v14 = vshrl.u32 (%p294_p10), %v314_v13, 7  ;;  %v318_v15 = vand.u32 (%p294_p10), 127, %v314_v13 }
  0x5e   : > { %s943_s11 = scalar_lea.vmem %s1021_s3, %s476_s27  ;;  %v302_v4 = vmul.f32 (%p294_p10), %v301_v3, %v301_v3 }
  0x5f   : > { %vm316_vm2 = vcmp.eq.s32.totalorder (%p294_p10), %v315_v14, 0  ;;  %vm319_vm3 = vcmp.eq.s32.totalorder (%p294_p10), %v318_v15, 0 }
  0x60   : > { %v304_v5 = vsel (%p294_p10), %vm303_vm1, %v302_v4, 0.0  ;;  %vm320_vm4 = vmand (%p294_p10), %vm316_vm2, %vm319_vm3 }
  0x61   : > { %305 = vadd.xlane.f32.xlu0 (%p294_p10), %v304_v5 }
  0x63   : > { %v321_v16 = vld [vmem:[%s936_s5] sm:$0xff] }
  0xee   : > { %v306_v6 = vpop.xlane.xlu0 %305 }
  0xef   : > { %v307_v7 = vrot.slane %v306_v6, 4 }
  0xf1   : > { %v308_v8 = vadd.f32 %v307_v7, %v306_v6 }
  0xf3   : > { %v309_v9 = vrot.slane %v308_v8, 2 }
  0xf5   : > { %v310_v10 = vadd.f32 %v309_v9, %v308_v8 }
  0xf7   : > { %v311_v11 = vrot.slane %v310_v10, 1 }
  0xf9   : > { %v312_v12 = vadd.f32 %v311_v11, %v310_v10 }
  0xfb   : > { %484 = vpush %v312_v12 }
 0x12c   : > { %s485_s6 = spop %484 }
 0x12d   : > { %v322_v17 = vstv %s485_s6 }
 0x12e   : > { %v323_v18 = vsel %vm320_vm4, %v322_v17, 0.0 }
 0x12f   : > { %v324_v19 = vadd.f32 %v323_v18, %v321_v16 }
 0x131   : > { %326 = vst.msk [vmem:[%s936_s5] sm:$0xff] %vm292_vm0, %v324_v19 }
 0x132 PF: > { %v329_v20 = vld [vmem:[%s243_s24] sm:$0xff]  ;;  %v335_v22 = vlaneseq  ;;  %s478_s9 = sshll.u32 %s743_s20, 3  ;;  %v330_v27 = vld [vmem:[%s943_s11] sm:$0xff]  ;;  %s480_s23 = sshll.u32 %s743_s20, 7 }
 0x133   : > { %v331_v21 = vadd.f32 1e-08, %v329_v20  ;;  %v337_v24 = vstv %s478_s9  ;;  %s360_s18 = sshll.u32 %s936_s5, 4  ;;  %s961_s14 = scalar_lea.hbm %s1022_s4, %s480_s23  ;;  %s963_s18 = int_to_ptr.vmem [resolvable:$true] %s360_s18 }
 0x134   : > { %v336_v23 = vshrl.u32 %v335_v22, 7  ;;  %s347_s27 = scalar_lea.sflag [#allocation4], %s272_s25  ;;  %s644_s26 = scalar_lea.vmem %s963_s18, 128 }
 0x135   : > { %584 = vlog2.f32 %v331_v21  ;;  %p645_p13 = scmp.ne.s32.totalorder %s963_s18, %s644_s26  ;;  %p1042_p9 = scmp.ne.s32.totalorder %s1031_s28, 0 }
 0x136   : > { %v338_v25 = vadd.s32 %v337_v24, %v336_v23  ;;  %s756_s20 = smov [#allocation7]  }
 0x137   : > { %p646_p1 = pnand %p645_p13, %p1042_p9  ;;  %s648_s10 = sshll.u32 %s756_s20, 4  ;;  %s649_s10 = int_to_ptr.vmem [resolvable:$false] %s648_s10 }
 0x138   : > { %vm339_vm5 = vcmp.lt.s32.totalorder %v338_v25, 8  ;;  %v342_v30 = vld [vmem:[%s936_s5] sm:$0xff]  ;;  %s650_s11 = scalar_lea.vmem %s649_s10, 256  ;;  %p651_p7 = scmp.lt.s32.totalorder %s963_s18, %s649_s10 }
 0x139   : > { %p647_p3 = pneg %p646_p1  ;;  %p652_p11 = scmp.lt.s32.totalorder %s650_s11, %s644_s26 }
 0x13b   : > { %p653_p12 = por %p652_p11, %p651_p7 }
 0x13d   : > { %p654_p0 = pnand %p653_p12, %p647_p3 }
 0x13f   : > { %v585_v26 = vpop.eup %584 }
 0x140   : > { %v333_v28 = vmul.f32 0.6931472, %v585_v26 }
 0x142   : > { %v334_v29 = vmul.f32 %v333_v28, %v330_v27 }
 0x144   : > { %v340_v31 = vsel %vm339_vm5, %v334_v29, 0.0 }
 0x145   : > { %v343_v32 = vsub.f32 %v342_v30, %v340_v31 }
 0x147   : > { %345 = vst.msk [vmem:[%s936_s5] sm:$0xff] %vm292_vm0, %v343_v32 }
 0x148   : > { %657 = shalt.err (!%p654_p0)
}
 0x149   : > { %s658_s25 = scalar_lea.hbm %s961_s14, 128  ;;  %s662_s13 = scalar_lea.hbm %s1022_s4, 256 }
 0x14a   : > { %p659_p5 = scmp.ne.s32.totalorder %s961_s14, %s658_s25  ;;  %p663_p2 = scmp.lt.u32.totalorder %s961_s14, %s1022_s4 }
 0x14b   : > { %p664_p4 = scmp.lt.u32.totalorder %s662_s13, %s658_s25  ;;  %p666_p13 = scmp.lt.u32.totalorder %s658_s25, %s961_s14 }
 0x14c   : > { %p660_p8 = pnand %p659_p5, %p1042_p9 }
 0x14d   : > { %p665_p10 = por %p664_p4, %p663_p2 }
 0x14e   : > { %p661_p6 = pneg %p660_p8 }
 0x14f   : > { %p667_p1 = por %p666_p13, %p665_p10 }
 0x151   : > { %p668_p3 = pnand %p667_p1, %p661_p6 }
 0x153   : > { %671 = shalt.err (!%p668_p3)
}
 0x154   : > { %492 = dma.vmem_to_hbm [thread:$0]  (%p1042_p9), %s963_s18, 128, %s961_s14, %s347_s27  }
 0x155 PF: > { %s372_s23 = sand.u32 1, %s723_s15   ;;  %p1043_p7 = scmp.ne.s32.totalorder %s1032_s29, 0 }
 0x156   : > { %p1044_p11 = scmp.ge.s32.totalorder %s751_s22, 2  ;;  %s373_s24 = scalar_lea.sflag [#allocation4], %s372_s23 }
 0x158   : > { %p503_p12 = pnand %p1044_p11, %p1043_p7 }
 0x15a   : > { %717 = dma.done.wait (!%p503_p12), %s373_s24, 128  }
 0x15b   : > { %719 = vsyncadd (!%p503_p12), %s373_s24, 4294967168  ;;  %s21_s22 = sadd.s32 1, %s751_s22   ;;  %s1045_s15 = smov %s727_s16 }
 0x15c   : > { %p18_p0 = scmp.ge.s32.totalorder %s21_s22, 4   ;;  %s1046_s16 = smov %s731_s17 }
 0x15d   : > { %s1047_s17 = smov %s894_s7  ;;  %s1048_s18 = smov %s739_s19 }
 0x15e   : > { %s1008_s19 = smov 0   ;;  %s1049_s20 = smov %s747_s21 }
 0x15f   : > { %s1050_s21 = smov %s1052_s8  ;;  %20 = sbr.rel (!%p18_p0) target bundleno = 8 (0x8), region = 97 }
 0x166   :  { %378 = vsyncpa [#allocation3], 1 }
 0x167   :  { %380 = vsyncpa [#allocation3 + $0x1], 1 }
 0x168   :  { %381 = vsyncpa [#allocation6], 1 }
 0x169   :  { %383 = vsyncpa [#allocation6 + $0x1], 1 }
 0x16a   :  { %384 = vsyncpa [#allocation4], 1 }
 0x16b   :  { %386 = vsyncpa [#allocation4 + $0x1], 1 }

</bundles_post_ra>
